<compile_context>
chip_gen: v7x
topology: tpu7x:2x2x1
jax: 0.10.0
libtpu: 0.0.40
codegen_flags: <defaults>
</compile_context>

<pallas_src>
import math
import functools

import jax
import jax.numpy as jnp
from jax.experimental import pallas as pl
from jax.experimental.pallas import tpu as pltpu


# ----------------------------- Pallas kernels -------------------------------

_TM_CAP = 512           # max rows per linear block (amortizes ~0.35us/step)
_VMEM_LIMIT = 32 * 1024 * 1024   # safe on v5e/v6e/v7x scoped defaults


def _round_up(x, m):
    return ((x + m - 1) // m) * m


def _gelu(x):
    # TODO(synk): PyTorch F.gelu default is the exact erf-based GELU; we use the
    # tanh approximation in-kernel (max abs err ~1e-3) since lax.erf lowering in
    # Mosaic is not guaranteed.
    c = math.sqrt(2.0 / math.pi)
    return 0.5 * x * (1.0 + jnp.tanh(c * (x + 0.044715 * x * x * x)))


def _linear_kernel(x_ref, w_ref, b_ref, o_ref, *, apply_gelu):
    x = x_ref[...]                                   # bf16 activation tile
    if apply_gelu:
        # gelu in f32 for accuracy; the invariant weight is never re-cast here.
        x = _gelu(x.astype(jnp.float32)).astype(jnp.bfloat16)
    acc = jnp.dot(x, w_ref[...], preferred_element_type=jnp.float32)
    o_ref[...] = (acc + b_ref[...]).astype(o_ref.dtype)


def linear_pallas(x, w, b, apply_gelu=False, out_dtype=jnp.bfloat16):
    """y = gelu?(x) @ w + b with x: [M, K], w: [K, N], b: [N].

    Activations/weights are cast to bf16 once in the wrapper (no-op if the
    caller already keeps them bf16); accumulation is f32, output dtype is
    configurable (bf16 internally, f32 for the final logits).
    """
    M, K = x.shape
    Kw, N = w.shape
    assert K == Kw
    x = x.astype(jnp.bfloat16)
    w = w.astype(jnp.bfloat16)
    b = b.astype(jnp.float32).reshape(1, N)
    if M <= 256:
        tm, grid_m = M, 1                       # one block == full array
    else:
        # v7x has 2 TensorCores: make sure the "parallel" M axis has >= 2 blocks.
        tm = min(_TM_CAP, _round_up(pl.cdiv(M, 2), 8))
        grid_m = pl.cdiv(M, tm)                 # ragged edge handled by Pallas
    return pl.pallas_call(
        functools.partial(_linear_kernel, apply_gelu=apply_gelu),
        out_shape=jax.ShapeDtypeStruct((M, N), out_dtype),
        grid=(grid_m,),
        in_specs=[
            pl.BlockSpec((tm, K), lambda i: (i, 0)),
            pl.BlockSpec((K, N), lambda i: (0, 0)),
            pl.BlockSpec((1, N), lambda i: (0, 0)),
        ],
        out_specs=pl.BlockSpec((tm, N), lambda i: (i, 0)),
        compiler_params=pltpu.CompilerParams(
            dimension_semantics=("parallel",),       # 2-TC sharding on v7x
            vmem_limit_bytes=_VMEM_LIMIT),
    )(x, w, b)


def _edge_attn_kernel(q_ref, k_ref, v_ref, scat_ref, scat_t_ref,
                      rq_ref, rk_ref, dsum_ref, expand_ref, rsum_ref,
                      rel_ref, o_ref):
    # Whole-array refs (no grid; toy sizes fit VMEM easily):
    #   q_ref:      [E, Si*HD]  bf16  gathered dst-side queries (HD = heads*dim)
    #   k_ref/v_ref:[E, Sj*HD]  bf16  gathered src-side keys / values; a_rel/m_rel
    #                                 and p_rel/sqrt(D) are pre-folded into k.
    #   scat_ref:   [Nd, E]     bf16  one-hot: scat[n, e] = 1 iff dst(e) == n
    #   scat_t_ref: [E, Nd]     bf16  its transpose (gathers group stats to edges)
    #   rq_ref:     [Si*HD, P*HD]     replicate q block i over all j   (0/1)
    #   rk_ref:     [Sj*HD, P*HD]     replicate k/v block j over all i (0/1)
    #   dsum_ref:   [P*HD, P*H]       per-(pair, head) lane-sum matrix (0/1)
    #   expand_ref: [P*H, P*HD]       per-(pair, head) lane-broadcast  (0/1)
    #   rsum_ref:   [P*HD, Si*HD]     sum over the Sj axis per i       (0/1)
    #   rel_ref:    [1, Si*HD]  f32   relation encoding (tiled over Si)
    #   o_ref:      [Nd, Si*HD] bf16  lane-dense output
    f32, bf16 = jnp.float32, jnp.bfloat16
    q = q_ref[...]
    k = k_ref[...]
    v = v_ref[...]
    scat = scat_ref[...]
    scat_t = scat_t_ref[...]

    # 1) replicate slots so every (i, j) pair is lane-dense, then ONE score
    #    matmul for all pairs/heads (replaces the unrolled Si*Sj tiny matmuls).
    q_rep = jnp.dot(q, rq_ref[...])                                   # [E, P*HD] bf16
    k_rep = jnp.dot(k, rk_ref[...])                                   # [E, P*HD] bf16
    v_rep = jnp.dot(v, rk_ref[...])                                   # [E, P*HD] bf16
    s = jnp.dot(q_rep * k_rep, dsum_ref[...],
                preferred_element_type=f32)                           # [E, P*H] f32

    # 2) exact per-destination-group max (PyG grouped-softmax semantics).
    #    TODO(synk): the [Nd, E, P*H] broadcast is fine at toy scale; replace
    #    with dst-sorted segment max when tiling for real graphs.
    neg = (scat.astype(f32) - 1.0) * 1e9                              # 0 / -1e9 [Nd, E]
    gmax = jnp.max(s[None, :, :] + neg[:, :, None], axis=1)           # [Nd, P*H]
    m_e = jnp.dot(scat_t, gmax.astype(bf16),
                  preferred_element_type=f32)                         # [E, P*H] per-edge
    # (bf16 rounding of gmax is a per-group constant -> softmax is unchanged)

    ex = jnp.exp(s - m_e)                                             # [E, P*H] f32, <= ~1
    ex_b = ex.astype(bf16)
    w = jnp.dot(ex_b, expand_ref[...])                                # [E, P*HD] bf16
    num = w * v_rep                                                   # [E, P*HD] bf16

    # 3) per-destination reductions == two bf16 MXU matmuls with the one-hot matrix.
    den = jnp.dot(scat, ex_b, preferred_element_type=f32)             # [Nd, P*H]
    agg = jnp.dot(scat, num, preferred_element_type=f32)              # [Nd, P*HD]
    inv = pl.reciprocal(den + 1e-16, approx=True)                     # EUP slot
    inv_hd = jnp.dot(inv.astype(bf16), expand_ref[...],
                     preferred_element_type=f32)                      # [Nd, P*HD]

    # 4) normalize, reduce over source slot j, add relation encoding; one
    #    lane-dense store (no in-kernel concatenates).
    outp = agg * inv_hd                                               # [Nd, P*HD] f32
    out = jnp.dot(outp.astype(bf16), rsum_ref[...],
                  preferred_element_type=f32)                         # [Nd, Si*HD]
    o_ref[...] = (out + rel_ref[...]).astype(o_ref.dtype)


_PAIR_MATS = {}


def _pair_matrices(Si, Sj, heads, D):
    """Constant 0/1 replication / reduction matrices for the attention kernel."""
    key = (Si, Sj, heads, D)
    if key not in _PAIR_MATS:
        f32 = jnp.float32
        HD = heads * D
        P = Si * Sj
        dsum = jnp.repeat(jnp.eye(heads, dtype=f32), D, axis=0)            # [HD, H]
        dsum_p = jnp.kron(jnp.eye(P, dtype=f32), dsum)                     # [P*HD, P*H]
        expand_p = jnp.transpose(dsum_p)                                   # [P*H, P*HD]
        rq = jnp.kron(jnp.eye(Si, dtype=f32),
                      jnp.kron(jnp.ones((1, Sj), f32),
                               jnp.eye(HD, dtype=f32)))                    # [Si*HD, P*HD]
        rk = jnp.kron(jnp.ones((1, Si), f32),
                      jnp.eye(Sj * HD, dtype=f32))                         # [Sj*HD, P*HD]
        rsum = jnp.transpose(rq)                                           # [P*HD, Si*HD]
        _PAIR_MATS[key] = tuple(m.astype(jnp.bfloat16)
                                for m in (rq, rk, dsum_p, expand_p, rsum))
    return _PAIR_MATS[key]


def edge_attention_pallas(q_e, k_e, v_e, scat, scat_t, rel_enc, heads,
                          out_dtype=jnp.bfloat16):
    """q_e: [E, Si, HD], k_e/v_e: [E, Sj, HD] (bf16), scat: [Nd, E] -> [Nd, Si, HD]."""
    E, Si, HD = q_e.shape
    Sj = k_e.shape[1]
    D = HD // heads
    Nd = scat.shape[0]
    rq, rk, dsum_p, expand_p, rsum = _pair_matrices(Si, Sj, heads, D)
    rel = jnp.tile(rel_enc.reshape(1, HD).astype(jnp.float32), (1, Si))   # [1, Si*HD]
    out = pl.pallas_call(
        _edge_attn_kernel,
        out_shape=jax.ShapeDtypeStruct((Nd, Si * HD), out_dtype),
        # TODO(synk): add (Nd parallel, E arbitrary) grid axes with VMEM scratch
        # accumulators + running group max for graphs that exceed v7x's 64 MiB
        # VMEM; on v5e/v6e larger whole-array tiles are acceptable.
        compiler_params=pltpu.CompilerParams(vmem_limit_bytes=_VMEM_LIMIT),
    )(q_e.reshape(E, Si * HD).astype(jnp.bfloat16),
      k_e.reshape(E, Sj * HD).astype(jnp.bfloat16),
      v_e.reshape(E, Sj * HD).astype(jnp.bfloat16),
      scat, scat_t, rq, rk, dsum_p, expand_p, rsum, rel)
    return out.reshape(Nd, Si, HD)


# ------------------------ parameter initialization --------------------------

def _init_linear(key, in_dim, out_dim):
    k1, k2 = jax.random.split(key)
    limit = 1.0 / math.sqrt(in_dim)
    w = jax.random.uniform(k1, (in_dim, out_dim), jnp.float32, -limit, limit)
    b = jax.random.uniform(k2, (out_dim,), jnp.float32, -limit, limit)
    return w, b


def _glorot(key, shape):
    fan_in, fan_out = shape[-2], shape[-1]
    limit = math.sqrt(6.0 / (fan_in + fan_out))
    return jax.random.uniform(key, shape, jnp.float32, -limit, limit)


def block_diag_heads(rel):
    # rel: [H, D, D] -> block-diagonal [H*D, H*D];
    # x2d @ block_diag == einsum('...hd,hdr->...hr', x, rel) with (h d) flattening.
    H, D, _ = rel.shape
    out = jnp.zeros((H * D, H * D), jnp.float32)
    for h in range(H):
        out = out.at[h * D:(h + 1) * D, h * D:(h + 1) * D].set(rel[h])
    return out


def init_params(key, node_types, edge_types, target, in_dims, hidden, heads,
                out_channels, num_layers):
    D = hidden // heads
    keys = iter(jax.random.split(key, 512))
    params = {}
    params['label_embedding'] = 0.1 * jax.random.normal(
        next(keys), (out_channels, hidden), jnp.float32)
    gain = math.sqrt(2.0)  # torch relu gain
    params['rel_encoding'] = {}
    for et in edge_types:
        name = '__'.join(et)
        v = _glorot(next(keys), (heads, D)) * gain
        params['rel_encoding'][name] = v.reshape(-1)
    # lazily-created per-(type, seq-slot) input linears; inputs here are 2D -> one slot
    params['lin_dict'] = {}
    for t in node_types:
        in_dim = in_dims[t] + (hidden if t == target else 0)
        params['lin_dict']['{}_0'.format(t)] = _init_linear(next(keys), in_dim, hidden)
    params['convs'] = []
    for _ in range(num_layers):
        conv = {'k_lin': {}, 'q_lin': {}, 'v_lin': {}, 'a_lin': {},
                'a_rel': {}, 'm_rel': {}, 'p_rel': {}}
        for t in node_types:
            conv['k_lin'][t] = _init_linear(next(keys), hidden, hidden)
            conv['q_lin'][t] = _init_linear(next(keys), hidden, hidden)
            conv['v_lin'][t] = _init_linear(next(keys), hidden, hidden)
            conv['a_lin'][t] = _init_linear(next(keys), hidden, hidden)
        for et in edge_types:
            name = '__'.join(et)
            conv['a_rel'][name] = block_diag_heads(_glorot(next(keys), (heads, D, D)))
            conv['m_rel'][name] = block_diag_heads(_glorot(next(keys), (heads, D, D)))
            conv['p_rel'][name] = jnp.ones((heads,), jnp.float32)  # ones(p_rel)
        params['convs'].append(conv)
    # final lazy Linear: each node type has exactly one incoming relation with this
    # metadata, so the sequence length doubles per conv layer -> S_final = 2**L.
    s_final = 2 ** num_layers
    params['lin'] = _init_linear(next(keys), s_final * hidden, out_channels)
    return params


# ------------------------------ model forward --------------------------------

def conv_forward(cp, x_dict, edge_index_dict, rel_encoding, edge_structs,
                 heads, hidden):
    D = hidden // heads
    edge_types = list(edge_index_dict.keys())

    # ---- fused per-type projection: [ q | (k@a_rel*scale, v@m_rel) per out-edge ] ----
    # Weight folding (tiny [hidden, hidden] matmuls) is done once per layer in
    # plain f32 JAX glue and cast to bf16 ONCE; the activations are read only
    # once, in a single bf16 Pallas matmul per type.
    proj, col_off = {}, {}
    for t, x in x_dict.items():
        wq, bq = cp['q_lin'][t]
        wk, bk = cp['k_lin'][t]
        wv, bv = cp['v_lin'][t]
        w_blocks, b_blocks = [wq], [bq]
        off = hidden
        for et in edge_types:
            if et[0] != t:
                continue
            name = '__'.join(et)
            a_rel = cp['a_rel'][name]           # [hidden, hidden] block-diagonal
            m_rel = cp['m_rel'][name]
            scale = jnp.repeat(cp['p_rel'][name], D) / math.sqrt(D)  # p_rel/sqrt(D) fold
            w_blocks += [(wk @ a_rel) * scale[None, :], wv @ m_rel]
            b_blocks += [(bk @ a_rel) * scale, bv @ m_rel]
            col_off[name] = off
            off += 2 * hidden
        w_fused = jnp.concatenate(w_blocks, axis=1).astype(jnp.bfloat16)
        b_fused = jnp.concatenate(b_blocks, axis=0)
        N, S, _ = x.shape
        proj[t] = linear_pallas(x.reshape(N * S, hidden), w_fused,
                                b_fused).reshape(N, S, -1)

    # ---- per-edge-type attention (scatter matrices reused from edge_structs) ----
    out_lists = {t: [] for t in x_dict}
    for et in edge_types:
        src, _, dst = et
        name = '__'.join(et)
        st = edge_structs[name]
        off = col_off[name]
        q = proj[dst][:, :, :hidden]                       # [Nd, Sd, hidden] bf16
        k = proj[src][:, :, off:off + hidden]              # [Ns, Ss, hidden]
        v = proj[src][:, :, off + hidden:off + 2 * hidden]
        # TODO(synk): move these data-dependent gathers into the kernel via
        # scalar-prefetched indices to avoid materializing [E, S, HD] copies.
        q_e = jnp.take(q, st['dst_idx'], axis=0)
        k_e = jnp.take(k, st['src_idx'], axis=0)
        v_e = jnp.take(v, st['src_idx'], axis=0)
        out = edge_attention_pallas(q_e, k_e, v_e, st['scat'], st['scat_t'],
                                    rel_encoding[name], heads)
        out_lists[dst].append(out)                          # [Nd, Sd, hidden] bf16

    # ---- group('cat') + a_lin(gelu(.)) + concat with input sequence ----
    new_x = {}
    for t, outs in out_lists.items():
        if len(outs) == 0:
            new_x[t] = None
            continue
        out = jnp.concatenate(outs, axis=1)
        N, Sc, _ = out.shape
        w, b = cp['a_lin'][t]
        out = linear_pallas(out.reshape(N * Sc, hidden), w, b,
                            apply_gelu=True).reshape(N, Sc, hidden)
        # nn.Dropout -> identity (eval mode)
        new_x[t] = jnp.concatenate([x_dict[t], out], axis=1)
    return new_x


def seqhgnn_lp_forward(params, x_dict, edge_index_dict, batch_y, batch_train_mask,
                       batch_size, target, hidden, heads):
    # label embeddings with masking
    y_embs = jnp.take(params['label_embedding'], batch_y, axis=0)        # [N_t, hidden]
    y_embs = jnp.where((batch_train_mask != 0)[:, None], y_embs, 0.0)
    y_embs = jnp.where((jnp.arange(y_embs.shape[0]) < batch_size)[:, None], 0.0, y_embs)

    # per-(type, seq-slot) input projections; model inputs are 2-D so there is
    # exactly one slot -> one Pallas launch per type, no transposes.
    x_input = {}
    for t, x_t in x_dict.items():
        if x_t.ndim == 2:
            x_t = x_t[:, None, :]
        N, S, _ = x_t.shape
        if t == target:
            y_exp = jnp.broadcast_to(y_embs[:, None, :], (N, S, hidden))
            x_t = jnp.concatenate([x_t, y_exp], axis=-1)
        slot_outs = []
        for idx in range(S):
            w, b = params['lin_dict']['{}_{}'.format(t, idx)]
            slot_outs.append(linear_pallas(x_t[:, idx, :], w, b))        # bf16 [N, hidden]
        x_input[t] = jnp.stack(slot_outs, axis=1)                        # [N, S, hidden]

    # layer-invariant per-relation scatter structures, hoisted out of the conv loop
    edge_structs = {}
    for et, edge_index in edge_index_dict.items():
        name = '__'.join(et)
        src_idx, dst_idx = edge_index[0], edge_index[1]
        Nd = x_input[et[2]].shape[0]
        scat = (jnp.arange(Nd, dtype=jnp.int32)[:, None]
                == dst_idx[None, :]).astype(jnp.bfloat16)                # [Nd, E]
        edge_structs[name] = {'src_idx': src_idx, 'dst_idx': dst_idx,
                              'scat': scat, 'scat_t': jnp.transpose(scat)}

    # conv stack
    for cp in params['convs']:
        x_input = conv_forward(cp, x_input, edge_index_dict, params['rel_encoding'],
                               edge_structs, heads, hidden)

    out = x_input[target]
    # flatten (dropout_channel is a no-op in eval mode)
    out = out.reshape(out.shape[0], -1)
    w, b = params['lin']
    return linear_pallas(out, w, b, out_dtype=jnp.float32)


# ----------------------------------- main ------------------------------------

if __name__ == "__main__":
    node_types = ['paper', 'author']
    edge_types = [('author', 'writes', 'paper'), ('paper', 'rev_writes', 'author')]
    target = 'paper'
    hidden = 32
    heads = 4
    out_channels = 4
    num_layers = 2
    N_p, N_a = 12, 8
    F_p, F_a = 24, 16
    E = 40
    batch_size = 4

    key = jax.random.PRNGKey(0)
    (k_param, k_xp, k_xa, k_e1s, k_e1d, k_e2s, k_e2d, k_y, k_m) = jax.random.split(key, 9)

    params = init_params(k_param, node_types, edge_types, target,
                         {'paper': F_p, 'author': F_a},
                         hidden, heads, out_channels, num_layers)

    x_dict = {
        'paper': jax.random.normal(k_xp, (N_p, F_p), jnp.float32),
        'author': jax.random.normal(k_xa, (N_a, F_a), jnp.float32),
    }
    edge_index_dict = {
        ('author', 'writes', 'paper'): jnp.stack([
            jax.random.randint(k_e1s, (E,), 0, N_a),
            jax.random.randint(k_e1d, (E,), 0, N_p)]).astype(jnp.int32),
        ('paper', 'rev_writes', 'author'): jnp.stack([
            jax.random.randint(k_e2s, (E,), 0, N_p),
            jax.random.randint(k_e2d, (E,), 0, N_a)]).astype(jnp.int32),
    }
    batch_y = jax.random.randint(k_y, (N_p,), 0, out_channels).astype(jnp.int32)
    batch_train_mask = (jax.random.uniform(k_m, (N_p,)) > 0.5).astype(jnp.int32)

    logits = seqhgnn_lp_forward(params, x_dict, edge_index_dict, batch_y,
                                batch_train_mask, batch_size, target, hidden, heads)
    logits = jax.block_until_ready(logits)
    assert logits.shape == (N_p, out_channels)
    assert bool(jnp.all(jnp.isfinite(logits)))
    print("KERNEL_OK")
</pallas_src>

<mosaic_0001>
module attributes {stable_mosaic.version = 11 : i64} {
  func.func @_linear_kernel(%arg0: i32, %arg1: memref<12x56xbf16, #tpu.memory_space<vmem>>, %arg2: memref<56x32xbf16, #tpu.memory_space<vmem>>, %arg3: memref<1x32xf32, #tpu.memory_space<vmem>>, %arg4: memref<12x32xbf16, #tpu.memory_space<vmem>>) attributes {dimension_semantics = [#tpu.dimension_semantics<parallel>], iteration_bounds = array<i64: 1>, scalar_prefetch = 0 : i64, scratch_operands = 0 : i64, tpu.core_type = #tpu.core_type<tc>, window_params = [{transform_indices = @transform_0, window_bounds = array<i64: 12, 56>}, {pipeline_mode = #tpu.pipeline_mode<synchronous>, transform_indices = @transform_1, window_bounds = array<i64: 56, 32>}, {pipeline_mode = #tpu.pipeline_mode<synchronous>, transform_indices = @transform_2, window_bounds = array<i64: 1, 32>}, {transform_indices = @transform_3, window_bounds = array<i64: 12, 32>}]} {
    %c0 = arith.constant 0 : index
    %c0_0 = arith.constant 0 : index
    %0 = vector.load %arg1[%c0, %c0_0] : memref<12x56xbf16, #tpu.memory_space<vmem>>, vector<12x56xbf16>
    %c0_1 = arith.constant 0 : index
    %c0_2 = arith.constant 0 : index
    %1 = vector.load %arg2[%c0_1, %c0_2] : memref<56x32xbf16, #tpu.memory_space<vmem>>, vector<56x32xbf16>
    %cst = arith.constant dense<0.000000e+00> : vector<12x32xf32>
    %2 = tpu.matmul %0, %1, %cst {dimension_numbers = #tpu.dot_dimension_numbers<[1], [0], [0], [1], [0, 0, 1, 1], [], []>} : vector<12x56xbf16>, vector<56x32xbf16>, vector<12x32xf32> -> vector<12x32xf32>
    %c0_3 = arith.constant 0 : index
    %c0_4 = arith.constant 0 : index
    %3 = vector.load %arg3[%c0_3, %c0_4] : memref<1x32xf32, #tpu.memory_space<vmem>>, vector<1x32xf32>
    %4 = vector.broadcast %3 : vector<1x32xf32> to vector<12x32xf32>
    %5 = arith.addf %2, %4 : vector<12x32xf32>
    %6 = arith.truncf %5 : vector<12x32xf32> to vector<12x32xbf16>
    %c0_5 = arith.constant 0 : index
    %c0_6 = arith.constant 0 : index
    %7 = vector.load %arg4[%c0_5, %c0_6] : memref<12x32xbf16, #tpu.memory_space<vmem>>, vector<12x32xbf16>
    tpu.vector_store %arg4[%c0_5, %c0_6], %6 {strides = array<i32>} : memref<12x32xbf16, #tpu.memory_space<vmem>>, vector<12x32xbf16>,
    return
  }
  func.func @transform_0(%arg0: i32) -> (i32, i32) {
    %c0_i32 = arith.constant 0 : i32
    %c0_i32_0 = arith.constant 0 : i32
    return %arg0, %c0_i32 : i32, i32
  }
  func.func @transform_1(%arg0: i32) -> (i32, i32) {
    %c0_i32 = arith.constant 0 : i32
    %c0_i32_0 = arith.constant 0 : i32
    %c0_i32_1 = arith.constant 0 : i32
    return %c0_i32, %c0_i32_0 : i32, i32
  }
  func.func @transform_2(%arg0: i32) -> (i32, i32) {
    %c0_i32 = arith.constant 0 : i32
    %c0_i32_0 = arith.constant 0 : i32
    %c0_i32_1 = arith.constant 0 : i32
    return %c0_i32, %c0_i32_0 : i32, i32
  }
  func.func @transform_3(%arg0: i32) -> (i32, i32) {
    %c0_i32 = arith.constant 0 : i32
    %c0_i32_0 = arith.constant 0 : i32
    return %arg0, %c0_i32 : i32, i32
  }
}

</mosaic_0001>

<bundles_post_ra>
// kernel: tpu_custom_call.1
= control target key start
LH: loop header
LB: loop body
LE: loop exit
PB: predicated region body
PF: predicated region fallthrough
CT: control target
= control target key end

     0   :  { %v197_v1 = vmov 0.0   ;;  %vm198_vm0 = vmmov 0   ;;  %s252_s0 = inlined_call_operand.vmem [shape: bf16[12,56], index: 0, kind: input, shape index: {}]   ;;  %s253_s1 = inlined_call_operand.vmem [shape: bf16[56,32], index: 1, kind: input, shape index: {}]   ;;  %s254_s2 = inlined_call_operand.vmem [shape: f32[1,32], index: 2, kind: input, shape index: {}]   ;;  %s255_s3 = inlined_call_operand.hbm [shape: bf16[12,32], index: 3, kind: output, shape index: {}]  }
   0x1   :  { %v168_v0 = vld [vmem:[%s253_s1] sm:$0xff]   ;;  %151 = vmatprep.subr.bf16.mxu0 %v197_v1  ;;  %v169_v2 = vld [vmem:[%s253_s1 + $0x8] sm:$0xff]   ;;  %159 = vmatprep.mubr.msk.bf16.mxu0 %vm198_vm0, %v197_v1 }
   0x2   :  { %152 = vmatpush3.bf16.msra.mxu0 %v168_v0 }
   0x3   :  { %153 = vmatprep.subr.bf16.mxu0 %v197_v1 }
   0x4   :  { %8 = vsyncpa [#allocation3], 0  ;;  %v170_v3 = vld [vmem:[%s253_s1 + $0x10] sm:$0xff]   ;;  %v171_v4 = vld [vmem:[%s253_s1 + $0x18] ss:$0 sps:$4 sm:$0xff]   ;;  %vm62_vm1 = vcmask 1043456  }
   0x5   :  { %v64_v5 = vsel %vm62_vm1, %v171_v4, 0  ;;  %v172_v6 = vld [vmem:[%s252_s0] sm:$0x3f]   ;;  %vm58_vm2 = vcmask 457728   ;;  %s199_s24 = smov [#allocation2]   ;;  %vm115_vm3 = vcmask 257024  }
   0x6   :  { %154 = vmatpush3.bf16.msra.mxu0 %v169_v2  ;;  %v135_v7 = vld [vmem:[%s254_s2] ss:$0 sm:$0xff]  ;;  %s124_s1 = sshll.u32 %s199_s24, 4  ;;  %vm117_vm4 = vcmask 254976   ;;  %s125_s1 = int_to_ptr.vmem [resolvable:$true] %s124_s1 }
   0x7   :  { %155 = vmatprep.subr.bf16.mxu0 %v197_v1  ;;  %s173_s0 = scalar_lea.vmem %s125_s1, 128  ;;  %p178_p1 = scmp.lt.s32.totalorder %s125_s1, %s125_s1 }
   0x8   :  { %p174_p0 = scmp.ne.s32.totalorder %s125_s1, %s173_s0  ;;  %p179_p2 = scmp.lt.s32.totalorder %s173_s0, %s173_s0 }
   0xa   :  { %156 = vmatpush3.bf16.msra.mxu0 %v170_v3  ;;  %p180_p3 = por %p179_p2, %p178_p1 }
   0xb   :  { %157 = vmatprep.subr.bf16.mxu0 %v197_v1 }
   0xc   :  { %p181_p4 = pnand %p180_p3, %p174_p0 }
   0xe   :  { %158 = vmatpush3.bf16.msra.mxu0 %v64_v5 }
  0x11   :  { %160 = vmatmul.mubr.msk.bf16.vlgmr.msra.gmra.mrb[0].mxu0 %vm58_vm2, %v172_v6 }
  0xe4   :  { %v100_v8 = vpop.f32.mrb[0].mxu0 }
  0xe5   :  { %v101_v9 = vadd.f32 %v135_v7, %v100_v8  ;;  %v161_v10 = vpop.f32.mrb[1].mxu0 }
  0xe6   :  { %v103_v11 = vpop.f32.mrb[2].mxu0 }
  0xe7   :  { %v144_v12 = vpack.c.bf16 %v101_v9, %v101_v9  ;;  %v104_v13 = vadd.f32 %v135_v7, %v103_v11  ;;  %v162_v14 = vpop.f32.mrb[3].mxu0 }
  0xe9   :  { %116 = vst.msk [vmem:[#allocation2] sm:$0xf] %vm115_vm3, %v144_v12  ;;  %v145_v15 = vpack.c.bf16 %v104_v13, %v104_v13 }
  0xeb   :  { %118 = vst.msk [vmem:[#allocation2 + $0x4] sm:$0x3] %vm117_vm4, %v145_v15 }
  0xec   :  { %184 = shalt.err (!%p181_p4)
}
  0xed   :  { %s185_s26 = scalar_lea.hbm %s255_s3, 128 }
  0xee   :  { %p186_p5 = scmp.ne.s32.totalorder %s255_s3, %s185_s26  ;;  %p189_p6 = scmp.lt.u32.totalorder %s185_s26, %s255_s3 }
  0xf0   :  { %p191_p7 = pnand %p189_p6, %p186_p5 }
  0xf2   :  { %194 = shalt.err (!%p191_p7)
}
  0xf3   :  { %s200_s4 = smov 64   ;;  %s201_s5 = smov 4  }
  0xf4   :  { %130 = dma.vmem_to_hbm [thread:$0]  %s125_s1, 128, %s255_s3, [#allocation3], %s200_s4, %s200_s4, %s201_s5  }
  0xf5   :  { %195 = dma.done.wait [#allocation3], 128  }
  0xf6   :  { %196 = vsyncadd [#allocation3], 4294967168 }
  0xf7   :  { %134 = vsyncpa [#allocation3], 1 }

</bundles_post_ra>
